<compile_context>
chip_gen: v7x
topology: tpu7x:2x2x1
jax: 0.10.0
libtpu: 0.0.40
codegen_flags: <defaults>
</compile_context>

<pallas_src>
import jax
import jax.numpy as jnp
from jax.experimental import pallas as pl
from jax.experimental.pallas import tpu as pltpu

# ---- model dims (match the PyTorch module) ----------------------------------
NUM_FEATURES_SHUFFLENET = 1024   # shufflenet_v2_x1_0 fc.in_features
NUM_FEATURES_EFFVIT = 192        # EfficientViT_M2 head.l.in_features
COMBINED = NUM_FEATURES_SHUFFLENET + NUM_FEATURES_EFFVIT  # 1216
HIDDEN1 = 512
HIDDEN2 = 256
BN_EPS = 1e-5
LANE = 128


# ------------------------------------------------------------------------------
# Pallas kernel: pooled -> folded-Linear1+ReLU -> Linear2+ReLU -> Linear3(pad)
# ------------------------------------------------------------------------------
def combined_model_kernel(x_ref, w1_ref, b1_ref, w2_ref, b2_ref, w3_ref, b3_ref,
                          out_ref):
    # global average pool over the (flattened) spatial axis
    pooled = jnp.mean(x_ref[...], axis=2)                                  # (TB, C) f32

    # layer 1: folded (backbone proj || concat || Linear(1216,512) || BN) + ReLU
    h1 = jnp.maximum(
        jnp.dot(pooled.astype(jnp.bfloat16), w1_ref[...],
                preferred_element_type=jnp.float32) + b1_ref[...], 0.0)    # (TB, 512)

    # layer 2: Linear(512,256) with BN folded + ReLU  (dropout = identity, eval)
    h2 = jnp.maximum(
        jnp.dot(h1.astype(jnp.bfloat16), w2_ref[...],
                preferred_element_type=jnp.float32) + b2_ref[...], 0.0)    # (TB, 256)

    # layer 3: Linear(256, num_classes) padded to 128 lanes
    out_ref[...] = jnp.dot(h2.astype(jnp.bfloat16), w3_ref[...],
                           preferred_element_type=jnp.float32) + b3_ref[...]


# ------------------------------------------------------------------------------
# Parameter construction (mirrors the PyTorch module, eval mode)
# ------------------------------------------------------------------------------
def make_params(key, in_channels, num_classes):
    ks = jax.random.split(key, 16)
    p = {}
    # stand-in backbone projections (see TODO at top of file)
    p["wsh"] = jax.random.normal(ks[0], (in_channels, NUM_FEATURES_SHUFFLENET),
                                 jnp.float32) * 0.05
    p["bsh"] = jax.random.normal(ks[1], (1, NUM_FEATURES_SHUFFLENET), jnp.float32) * 0.01
    p["wev"] = jax.random.normal(ks[2], (in_channels, NUM_FEATURES_EFFVIT),
                                 jnp.float32) * 0.05
    p["bev"] = jax.random.normal(ks[3], (1, NUM_FEATURES_EFFVIT), jnp.float32) * 0.01

    # classifier layer 1: Linear(1216, 512) + BatchNorm1d(512), BN folded (eval)
    w1 = jax.random.normal(ks[4], (COMBINED, HIDDEN1), jnp.float32) * 0.02
    b1 = jax.random.normal(ks[5], (HIDDEN1,), jnp.float32) * 0.01
    g1 = 1.0 + 0.1 * jax.random.normal(ks[6], (HIDDEN1,), jnp.float32)
    be1 = 0.1 * jax.random.normal(ks[7], (HIDDEN1,), jnp.float32)
    rm1 = 0.1 * jax.random.normal(ks[8], (HIDDEN1,), jnp.float32)
    rv1 = 0.5 + jax.random.uniform(ks[9], (HIDDEN1,), jnp.float32)
    s1 = g1 / jnp.sqrt(rv1 + BN_EPS)
    p["w1"] = w1 * s1[None, :]
    p["b1"] = ((b1 - rm1) * s1 + be1)[None, :]

    # classifier layer 2: Linear(512, 256) + BatchNorm1d(256), BN folded (eval)
    w2 = jax.random.normal(ks[10], (HIDDEN1, HIDDEN2), jnp.float32) * 0.02
    b2 = jax.random.normal(ks[11], (HIDDEN2,), jnp.float32) * 0.01
    g2 = 1.0 + 0.1 * jax.random.normal(ks[12], (HIDDEN2,), jnp.float32)
    be2 = 0.1 * jax.random.normal(ks[13], (HIDDEN2,), jnp.float32)
    rm2 = 0.1 * jax.random.normal(ks[14], (HIDDEN2,), jnp.float32)
    rv2 = 0.5 + jax.random.uniform(ks[15], (HIDDEN2,), jnp.float32)
    s2 = g2 / jnp.sqrt(rv2 + BN_EPS)
    p["w2"] = w2 * s2[None, :]
    p["b2"] = ((b2 - rm2) * s2 + be2)[None, :]

    # classifier layer 3: Linear(256, num_classes)
    k17, k18 = jax.random.split(ks[0])
    p["w3"] = jax.random.normal(k17, (HIDDEN2, num_classes), jnp.float32) * 0.02
    p["b3"] = (jax.random.normal(k18, (num_classes,), jnp.float32) * 0.01)[None, :]
    return p


def fold_params(p, num_classes):
    """Host-side fold of the affine pre-ReLU chain + bf16 weight cast + lane pad."""
    # concat(backbone projections) @ w1  ->  (C, 512); same for the bias chain.
    w_cat = jnp.concatenate([p["wsh"], p["wev"]], axis=1)          # (C, 1216)
    b_cat = jnp.concatenate([p["bsh"], p["bev"]], axis=1)          # (1, 1216)
    w_eff = w_cat @ p["w1"]                                        # (C, 512)
    b_eff = b_cat @ p["w1"] + p["b1"]                              # (1, 512)

    nc_pad = pl.cdiv(num_classes, LANE) * LANE                     # lane-dense output
    w3p = jnp.zeros((HIDDEN2, nc_pad), jnp.float32).at[:, :num_classes].set(p["w3"])
    b3p = jnp.zeros((1, nc_pad), jnp.float32).at[:, :num_classes].set(p["b3"])

    return {
        "w1": w_eff.astype(jnp.bfloat16), "b1": b_eff.astype(jnp.float32),
        "w2": p["w2"].astype(jnp.bfloat16), "b2": p["b2"].astype(jnp.float32),
        "w3": w3p.astype(jnp.bfloat16), "b3": b3p.astype(jnp.float32),
        "nc_pad": nc_pad,
    }


# ------------------------------------------------------------------------------
# Wrapper: batch-tiled pallas_call
# ------------------------------------------------------------------------------
def combined_model_forward(x_nchw, folded, num_classes, *, max_block_b=256):
    B, C, H, W = x_nchw.shape
    HW = H * W
    x3 = x_nchw.reshape(B, C, HW).astype(jnp.float32)   # glue reshape only

    w1, b1 = folded["w1"], folded["b1"]
    w2, b2 = folded["w2"], folded["b2"]
    w3, b3 = folded["w3"], folded["b3"]
    nc_pad = folded["nc_pad"]

    TB = B if B <= max_block_b else max_block_b         # batch tile
    grid = (pl.cdiv(B, TB),)

    in_specs = [
        pl.BlockSpec((TB, C, HW), lambda i: (i, 0, 0)),      # x: tiled over batch
        pl.BlockSpec(w1.shape, lambda i: (0, 0)),            # weights: VMEM-resident
        pl.BlockSpec(b1.shape, lambda i: (0, 0)),
        pl.BlockSpec(w2.shape, lambda i: (0, 0)),
        pl.BlockSpec(b2.shape, lambda i: (0, 0)),
        pl.BlockSpec(w3.shape, lambda i: (0, 0)),
        pl.BlockSpec(b3.shape, lambda i: (0, 0)),
    ]
    out_spec = pl.BlockSpec((TB, nc_pad), lambda i: (i, 0))

    out_padded = pl.pallas_call(
        combined_model_kernel,
        out_shape=jax.ShapeDtypeStruct((B, nc_pad), jnp.float32),
        grid=grid,
        in_specs=in_specs,
        out_specs=out_spec,
        compiler_params=pltpu.CompilerParams(
            dimension_semantics=("parallel",),
            vmem_limit_bytes=16 << 20,
        ),
    )(x3, w1, b1, w2, b2, w3, b3)

    return out_padded[:, :num_classes]


# ------------------------------------------------------------------------------
# Pure-JAX reference (original, unfolded module path; f32 throughout)
# ------------------------------------------------------------------------------
def reference_forward(x_nchw, p):
    B, C, H, W = x_nchw.shape
    pooled = jnp.mean(x_nchw.reshape(B, C, H * W), axis=2)
    f_sh = pooled @ p["wsh"] + p["bsh"]
    f_ev = pooled @ p["wev"] + p["bev"]
    comb = jnp.concatenate([f_sh, f_ev], axis=1)
    h1 = jnp.maximum(comb @ p["w1"] + p["b1"], 0.0)
    h2 = jnp.maximum(h1 @ p["w2"] + p["b2"], 0.0)
    return h2 @ p["w3"] + p["b3"]


if __name__ == "__main__":
    B, C, H, W = 2, 4, 16, 16
    num_classes = 10

    key = jax.random.PRNGKey(0)
    kx, kp = jax.random.split(key)
    x = jax.random.normal(kx, (B, C, H, W), jnp.float32)
    params = make_params(kp, C, num_classes)
    folded = fold_params(params, num_classes)

    out = combined_model_forward(x, folded, num_classes)
    out = jax.block_until_ready(out)

    ref = reference_forward(x, params)
    # tolerance accounts for bf16 weight storage in the kernel vs f32 reference
    if not jnp.allclose(out, ref, atol=1e-3, rtol=1e-2):
        max_err = jnp.max(jnp.abs(out - ref))
        raise AssertionError(f"Pallas kernel output mismatch (max abs err {max_err})")

    print("KERNEL_OK")
</pallas_src>

<mosaic_0001>
module attributes {stable_mosaic.version = 11 : i64} {
  func.func @combined_model_kernel(%arg0: i32, %arg1: memref<2x4x256xf32, #tpu.memory_space<vmem>>, %arg2: memref<4x512xbf16, #tpu.memory_space<vmem>>, %arg3: memref<1x512xf32, #tpu.memory_space<vmem>>, %arg4: memref<512x256xbf16, #tpu.memory_space<vmem>>, %arg5: memref<1x256xf32, #tpu.memory_space<vmem>>, %arg6: memref<256x128xbf16, #tpu.memory_space<vmem>>, %arg7: memref<1x128xf32, #tpu.memory_space<vmem>>, %arg8: memref<2x128xf32, #tpu.memory_space<vmem>>) attributes {dimension_semantics = [#tpu.dimension_semantics<parallel>], iteration_bounds = array<i64: 1>, scalar_prefetch = 0 : i64, scratch_operands = 0 : i64, tpu.core_type = #tpu.core_type<tc>, window_params = [{transform_indices = @transform_0, window_bounds = array<i64: 2, 4, 256>}, {pipeline_mode = #tpu.pipeline_mode<synchronous>, transform_indices = @transform_1, window_bounds = array<i64: 4, 512>}, {pipeline_mode = #tpu.pipeline_mode<synchronous>, transform_indices = @transform_2, window_bounds = array<i64: 1, 512>}, {pipeline_mode = #tpu.pipeline_mode<synchronous>, transform_indices = @transform_3, window_bounds = array<i64: 512, 256>}, {pipeline_mode = #tpu.pipeline_mode<synchronous>, transform_indices = @transform_4, window_bounds = array<i64: 1, 256>}, {pipeline_mode = #tpu.pipeline_mode<synchronous>, transform_indices = @transform_5, window_bounds = array<i64: 256, 128>}, {pipeline_mode = #tpu.pipeline_mode<synchronous>, transform_indices = @transform_6, window_bounds = array<i64: 1, 128>}, {transform_indices = @transform_7, window_bounds = array<i64: 2, 128>}]} {
    %c0 = arith.constant 0 : index
    %c0_0 = arith.constant 0 : index
    %c0_1 = arith.constant 0 : index
    %0 = vector.load %arg1[%c0, %c0_0, %c0_1] : memref<2x4x256xf32, #tpu.memory_space<vmem>>, vector<2x4x256xf32>
    %cst = arith.constant dense<0.000000e+00> : vector<2x4xf32>
    %1 = vector.multi_reduction <add>, %0, %cst [2] : vector<2x4x256xf32> to vector<2x4xf32>
    %cst_2 = arith.constant 2.560000e+02 : f32
    %2 = vector.broadcast %cst_2 : f32 to vector<2x4xf32>
    %3 = arith.divf %1, %2 : vector<2x4xf32>
    %4 = arith.truncf %3 : vector<2x4xf32> to vector<2x4xbf16>
    %c0_3 = arith.constant 0 : index
    %c0_4 = arith.constant 0 : index
    %5 = vector.load %arg2[%c0_3, %c0_4] : memref<4x512xbf16, #tpu.memory_space<vmem>>, vector<4x512xbf16>
    %cst_5 = arith.constant dense<0.000000e+00> : vector<2x512xf32>
    %6 = tpu.matmul %4, %5, %cst_5 {dimension_numbers = #tpu.dot_dimension_numbers<[1], [0], [0], [1], [0, 0, 1, 1], [], []>} : vector<2x4xbf16>, vector<4x512xbf16>, vector<2x512xf32> -> vector<2x512xf32>
    %c0_6 = arith.constant 0 : index
    %c0_7 = arith.constant 0 : index
    %7 = vector.load %arg3[%c0_6, %c0_7] : memref<1x512xf32, #tpu.memory_space<vmem>>, vector<1x512xf32>
    %8 = vector.broadcast %7 : vector<1x512xf32> to vector<2x512xf32>
    %9 = arith.addf %6, %8 : vector<2x512xf32>
    %cst_8 = arith.constant 0.000000e+00 : f32
    %10 = vector.broadcast %cst_8 : f32 to vector<2x512xf32>
    %11 = arith.maximumf %9, %10 : vector<2x512xf32>
    %12 = arith.truncf %11 : vector<2x512xf32> to vector<2x512xbf16>
    %c0_9 = arith.constant 0 : index
    %c0_10 = arith.constant 0 : index
    %13 = vector.load %arg4[%c0_9, %c0_10] : memref<512x256xbf16, #tpu.memory_space<vmem>>, vector<512x256xbf16>
    %cst_11 = arith.constant dense<0.000000e+00> : vector<2x256xf32>
    %14 = tpu.matmul %12, %13, %cst_11 {dimension_numbers = #tpu.dot_dimension_numbers<[1], [0], [0], [1], [0, 0, 1, 1], [], []>} : vector<2x512xbf16>, vector<512x256xbf16>, vector<2x256xf32> -> vector<2x256xf32>
    %c0_12 = arith.constant 0 : index
    %c0_13 = arith.constant 0 : index
    %15 = vector.load %arg5[%c0_12, %c0_13] : memref<1x256xf32, #tpu.memory_space<vmem>>, vector<1x256xf32>
    %16 = vector.broadcast %15 : vector<1x256xf32> to vector<2x256xf32>
    %17 = arith.addf %14, %16 : vector<2x256xf32>
    %cst_14 = arith.constant 0.000000e+00 : f32
    %18 = vector.broadcast %cst_14 : f32 to vector<2x256xf32>
    %19 = arith.maximumf %17, %18 : vector<2x256xf32>
    %20 = arith.truncf %19 : vector<2x256xf32> to vector<2x256xbf16>
    %c0_15 = arith.constant 0 : index
    %c0_16 = arith.constant 0 : index
    %21 = vector.load %arg6[%c0_15, %c0_16] : memref<256x128xbf16, #tpu.memory_space<vmem>>, vector<256x128xbf16>
    %cst_17 = arith.constant dense<0.000000e+00> : vector<2x128xf32>
    %22 = tpu.matmul %20, %21, %cst_17 {dimension_numbers = #tpu.dot_dimension_numbers<[1], [0], [0], [1], [0, 0, 1, 1], [], []>} : vector<2x256xbf16>, vector<256x128xbf16>, vector<2x128xf32> -> vector<2x128xf32>
    %c0_18 = arith.constant 0 : index
    %c0_19 = arith.constant 0 : index
    %23 = vector.load %arg7[%c0_18, %c0_19] : memref<1x128xf32, #tpu.memory_space<vmem>>, vector<1x128xf32>
    %24 = vector.broadcast %23 : vector<1x128xf32> to vector<2x128xf32>
    %25 = arith.addf %22, %24 : vector<2x128xf32>
    %c0_20 = arith.constant 0 : index
    %c0_21 = arith.constant 0 : index
    %26 = vector.load %arg8[%c0_20, %c0_21] : memref<2x128xf32, #tpu.memory_space<vmem>>, vector<2x128xf32>
    tpu.vector_store %arg8[%c0_20, %c0_21], %25 {strides = array<i32>} : memref<2x128xf32, #tpu.memory_space<vmem>>, vector<2x128xf32>,
    return
  }
  func.func @transform_0(%arg0: i32) -> (i32, i32, i32) {
    %c0_i32 = arith.constant 0 : i32
    %c0_i32_0 = arith.constant 0 : i32
    %c0_i32_1 = arith.constant 0 : i32
    return %arg0, %c0_i32, %c0_i32_0 : i32, i32, i32
  }
  func.func @transform_1(%arg0: i32) -> (i32, i32) {
    %c0_i32 = arith.constant 0 : i32
    %c0_i32_0 = arith.constant 0 : i32
    %c0_i32_1 = arith.constant 0 : i32
    return %c0_i32, %c0_i32_0 : i32, i32
  }
  func.func @transform_2(%arg0: i32) -> (i32, i32) {
    %c0_i32 = arith.constant 0 : i32
    %c0_i32_0 = arith.constant 0 : i32
    %c0_i32_1 = arith.constant 0 : i32
    return %c0_i32, %c0_i32_0 : i32, i32
  }
  func.func @transform_3(%arg0: i32) -> (i32, i32) {
    %c0_i32 = arith.constant 0 : i32
    %c0_i32_0 = arith.constant 0 : i32
    %c0_i32_1 = arith.constant 0 : i32
    return %c0_i32, %c0_i32_0 : i32, i32
  }
  func.func @transform_4(%arg0: i32) -> (i32, i32) {
    %c0_i32 = arith.constant 0 : i32
    %c0_i32_0 = arith.constant 0 : i32
    %c0_i32_1 = arith.constant 0 : i32
    return %c0_i32, %c0_i32_0 : i32, i32
  }
  func.func @transform_5(%arg0: i32) -> (i32, i32) {
    %c0_i32 = arith.constant 0 : i32
    %c0_i32_0 = arith.constant 0 : i32
    %c0_i32_1 = arith.constant 0 : i32
    return %c0_i32, %c0_i32_0 : i32, i32
  }
  func.func @transform_6(%arg0: i32) -> (i32, i32) {
    %c0_i32 = arith.constant 0 : i32
    %c0_i32_0 = arith.constant 0 : i32
    %c0_i32_1 = arith.constant 0 : i32
    return %c0_i32, %c0_i32_0 : i32, i32
  }
  func.func @transform_7(%arg0: i32) -> (i32, i32) {
    %c0_i32 = arith.constant 0 : i32
    %c0_i32_0 = arith.constant 0 : i32
    return %arg0, %c0_i32 : i32, i32
  }
}

</mosaic_0001>

<bundles_post_ra>
// kernel: tpu_custom_call.1
= control target key start
LH: loop header
LB: loop body
LE: loop exit
PB: predicated region body
PF: predicated region fallthrough
CT: control target
= control target key end

     0   :  { %12 = vsyncpa [#allocation3], 0  ;;  %s1457_s0 = inlined_call_operand.hbm [shape: f32[2,4,256], index: 0, kind: input, shape index: {}]   ;;  %s1458_s1 = inlined_call_operand.hbm [shape: bf16[4,512], index: 1, kind: input, shape index: {}]   ;;  %s1459_s2 = inlined_call_operand.vmem [shape: f32[1,512], index: 2, kind: input, shape index: {}]   ;;  %s1460_s3 = inlined_call_operand.hbm [shape: bf16[512,256], index: 3, kind: input, shape index: {}]   ;;  %s1461_s4 = inlined_call_operand.vmem [shape: f32[1,256], index: 4, kind: input, shape index: {}]   ;;  %s1462_s5 = inlined_call_operand.hbm [shape: bf16[256,128], index: 5, kind: input, shape index: {}]   ;;  %s1463_s6 = inlined_call_operand.vmem [shape: f32[1,128], index: 6, kind: input, shape index: {}]   ;;  %s1464_s7 = inlined_call_operand.hbm [shape: f32[2,128], index: 7, kind: output, shape index: {}]  }
   0x1   :  { %13 = vsyncpa [#allocation6], 0 }
   0x2   :  { %14 = vsyncpa [#allocation9], 0 }
   0x3   :  { %15 = vsyncpa [#allocation4], 0  ;;  %s1300_s24 = smov [#allocation5]   ;;  %s1301_s26 = smov [#allocation2]  }
   0x4   :  { %s34_s25 = sshll.u32 %s1300_s24, 4  ;;  %s21_s27 = sshll.u32 %s1301_s26, 4  ;;  %s35_s25 = int_to_ptr.vmem [resolvable:$true] %s34_s25  ;;  %s1351_s27 = int_to_ptr.vmem [resolvable:$true] %s21_s27 }
   0x5   :  { %s1182_s30 = scalar_lea.hbm %s1458_s1, 128 }
   0x6   :  { %p1183_p0 = scmp.ne.s32.totalorder %s1458_s1, %s1182_s30  ;;  %p1186_p1 = scmp.lt.u32.totalorder %s1182_s30, %s1458_s1 }
   0x8   :  { %p1188_p2 = pnand %p1186_p1, %p1183_p0 }
   0xa   :  { %1191 = shalt.err (!%p1188_p2)
}
   0xb   :  { %s1192_s12 = scalar_lea.vmem %s35_s25, 128  ;;  %p1197_p4 = scmp.lt.s32.totalorder %s35_s25, %s35_s25 }
   0xc   :  { %p1193_p3 = scmp.ne.s32.totalorder %s35_s25, %s1192_s12  ;;  %p1198_p5 = scmp.lt.s32.totalorder %s1192_s12, %s1192_s12 }
   0xe   :  { %p1199_p6 = por %p1198_p5, %p1197_p4 }
  0x10   :  { %p1200_p7 = pnand %p1199_p6, %p1193_p3 }
  0x12   :  { %1203 = shalt.err (!%p1200_p7)
}
  0x13   :  { %37 = dma.hbm_to_vmem [thread:$0]  %s1458_s1, 128, %s35_s25, [#allocation6]  }
  0x14   :  { %s1204_s17 = scalar_lea.hbm %s1457_s0, 256 }
  0x15   :  { %p1205_p8 = scmp.ne.s32.totalorder %s1457_s0, %s1204_s17  ;;  %p1208_p9 = scmp.lt.u32.totalorder %s1204_s17, %s1457_s0 }
  0x17   :  { %p1210_p10 = pnand %p1208_p9, %p1205_p8 }
  0x19   :  { %1213 = shalt.err (!%p1210_p10)
}
  0x1a   :  { %s1214_s22 = scalar_lea.vmem %s1351_s27, 256  ;;  %p1219_p12 = scmp.lt.s32.totalorder %s1351_s27, %s1351_s27 }
  0x1b   :  { %p1215_p11 = scmp.ne.s32.totalorder %s1351_s27, %s1214_s22  ;;  %p1220_p13 = scmp.lt.s32.totalorder %s1214_s22, %s1214_s22 }
  0x1d   :  { %p1221_p0 = por %p1220_p13, %p1219_p12 }
  0x1f   :  { %p1222_p1 = pnand %p1221_p0, %p1215_p11 }
  0x21   :  { %1225 = shalt.err (!%p1222_p1)
}
  0x22   :  { %s1302_s1 = smov 128   ;;  %s1303_s23 = smov 8  }
  0x23   :  { %27 = dma.hbm_to_vmem [thread:$0]  %s1457_s0, 256, %s1351_s27, [#allocation3], %s1302_s1, %s1302_s1, %s1303_s23  }
  0x24   :  { %s1304_s26 = smov [#allocation7]   ;;  %s1305_s29 = smov [#allocation8]  }
  0x25   :  { %s45_s28 = sshll.u32 %s1304_s26, 4  ;;  %s59_s30 = sshll.u32 %s1305_s29, 4  ;;  %s46_s28 = int_to_ptr.vmem [resolvable:$true] %s45_s28  ;;  %s1382_s30 = int_to_ptr.vmem [resolvable:$true] %s59_s30 }
  0x26   :  { %s1226_s10 = scalar_lea.hbm %s1460_s3, 8192 }
  0x27   :  { %p1227_p2 = scmp.ne.s32.totalorder %s1460_s3, %s1226_s10  ;;  %p1230_p3 = scmp.lt.u32.totalorder %s1226_s10, %s1460_s3 }
  0x29   :  { %p1232_p4 = pnand %p1230_p3, %p1227_p2 }
  0x2b   :  { %1235 = shalt.err (!%p1232_p4)
}
  0x2c   :  { %s1236_s0 = scalar_lea.vmem %s46_s28, 8192  ;;  %p1241_p6 = scmp.lt.s32.totalorder %s46_s28, %s46_s28 }
  0x2d   :  { %p1237_p5 = scmp.ne.s32.totalorder %s46_s28, %s1236_s0  ;;  %p1242_p7 = scmp.lt.s32.totalorder %s1236_s0, %s1236_s0 }
  0x2f   :  { %p1243_p8 = por %p1242_p7, %p1241_p6 }
  0x31   :  { %p1244_p9 = pnand %p1243_p8, %p1237_p5 }
  0x33   :  { %1247 = shalt.err (!%p1244_p9)
}
  0x34   :  { %51 = dma.hbm_to_vmem [thread:$0]  %s1460_s3, 8192, %s46_s28, [#allocation6], %s1302_s1, %s1302_s1, %s1303_s23  }
  0x35   :  { %s1248_s18 = scalar_lea.hbm %s1462_s5, 2048 }
  0x36   :  { %p1249_p10 = scmp.ne.s32.totalorder %s1462_s5, %s1248_s18  ;;  %p1252_p11 = scmp.lt.u32.totalorder %s1248_s18, %s1462_s5 }
  0x38   :  { %p1254_p12 = pnand %p1252_p11, %p1249_p10 }
  0x3a   :  { %1257 = shalt.err (!%p1254_p12)
}
  0x3b   :  { %s1258_s24 = scalar_lea.vmem %s1382_s30, 2048  ;;  %p1263_p0 = scmp.lt.s32.totalorder %s1382_s30, %s1382_s30 }
  0x3c   :  { %p1259_p13 = scmp.ne.s32.totalorder %s1382_s30, %s1258_s24  ;;  %p1264_p1 = scmp.lt.s32.totalorder %s1258_s24, %s1258_s24 }
  0x3e   :  { %p1265_p2 = por %p1264_p1, %p1263_p0 }
  0x40   :  { %p1266_p3 = pnand %p1265_p2, %p1259_p13 }
  0x42   :  { %1269 = shalt.err (!%p1266_p3)
}
  0x43   :  { %s1306_s3 = smov 64   ;;  %s1307_s1 = smov 4  }
  0x44   :  { %65 = dma.hbm_to_vmem [thread:$0]  %s1462_s5, 2048, %s1382_s30, [#allocation9], %s1306_s3, %s1306_s3, %s1307_s1  }
  0x45   :  { %1292 = dma.done.wait [#allocation3], 256  }
  0x46   :  { %1293 = vsyncadd [#allocation3], 4294967040 }
  0x47   :  { %1294 = dma.done.wait [#allocation6], 8320  }
  0x48   :  { %1295 = vsyncadd [#allocation6], 4294958976 }
  0x49   :  { %1296 = dma.done.wait [#allocation9], 2048  }
  0x4a   :  { %1297 = vsyncadd [#allocation9], 4294965248  ;;  %vm89_vm0 = vcmask 1043456   ;;  %v81_v0 = vld [vmem:[#allocation2] sm:$0xff]  ;;  %v82_v1 = vld [vmem:[#allocation2 + $0x8] sm:$0xff]  ;;  %v108_v10 = vlaneseq  ;;  %vm167_vm1 = vcmask 1041408  }
  0x4b   :  { %v85_v2 = vcombine.high %v81_v0, %v81_v0  ;;  %v90_v3 = vsel %vm89_vm0, %v81_v0, 0.0  ;;  %v86_v4 = vcombine.high %v82_v1, %v82_v1  ;;  %v95_v6 = vsel %vm89_vm0, %v82_v1, 0.0  ;;  %v105_v16 = vld [vmem:[#allocation5] sm:$0xff]  ;;  %v1070_v25 = vld [vmem:[#allocation7 + $0x4] ss:$8 sps:$4 sm:$0xff]   ;;  %s1310_s30 = smov [#allocation10]  }
  0x4c   :  { %v1414_v11 = vshrl.u32 %v108_v10, 7  ;;  %v1308_v12 = vmov 1983009808   ;;  %v146_v20 = vcombine.high %v105_v16, %v105_v16  ;;  %v1309_v21 = vmov 0   ;;  %v1072_v26 = vld [vmem:[#allocation7] ss:$8 sps:$4 sm:$0xff]   ;;  %666 = vmatprep.subr.bf16.mxu1 %v1070_v25 }
  0x4d   :  { %v91_v5 = vsel %vm89_vm0, %v85_v2, 0.0  ;;  %v96_v7 = vsel %vm89_vm0, %v86_v4, 0.0  ;;  %v148_v13 = vunpack.c.l.s4 %v1308_v12  ;;  %212 = vmatprep.mubr.bf16.mxu0 %v1309_v21  ;;  %v1073_v27 = vld [vmem:[#allocation7 + $0x14] ss:$8 sps:$4 sm:$0xff]   ;;  %667 = vmatpush1.bf16.msra.mxu1 %v1072_v26  ;;  %v1075_v28 = vld [vmem:[#allocation7 + $0x10] ss:$8 sps:$4 sm:$0xff]  }
  0x4e   :  { %v92_v8 = vadd.f32 %v91_v5, %v90_v3  ;;  %v97_v9 = vadd.f32 %v96_v7, %v95_v6  ;;  %668 = vmatprep.subr.bf16.mxu1 %v1073_v27  ;;  %v1076_v29 = vld [vmem:[#allocation7 + $0x24] ss:$8 sps:$4 sm:$0xff]   ;;  %v1081_v30 = vld [vmem:[#allocation7 + $0x20] ss:$8 sps:$4 sm:$0xff]   ;;  %v1082_v31 = vld [vmem:[#allocation7 + $0x34] ss:$8 sps:$4 sm:$0xff]  }
  0x4f   :  { %v149_v14 = vunpack.c.0.s8 %v148_v13  ;;  %v1087_v32 = vld [vmem:[#allocation7 + $0x30] ss:$8 sps:$4 sm:$0xff]   ;;  %v1088_v33 = vld [vmem:[#allocation7 + $0x44] ss:$8 sps:$4 sm:$0xff]   ;;  %v1093_v34 = vld [vmem:[#allocation7 + $0x40] ss:$8 sps:$4 sm:$0xff]  }
  0x50   :  { %93 = vadd.xlane.f32.xlu0 %v92_v8  ;;  %v1094_v35 = vld [vmem:[#allocation7 + $0x54] ss:$8 sps:$4 sm:$0xff]   ;;  %v1099_v36 = vld [vmem:[#allocation7 + $0x50] ss:$8 sps:$4 sm:$0xff]   ;;  %v1100_v37 = vld [vmem:[#allocation7 + $0x64] ss:$8 sps:$4 sm:$0xff]  }
  0x51   :  { %v152_v15 = vsub.s32 %v149_v14, %v1414_v11  ;;  %669 = vmatpush1.bf16.msra.mxu1 %v1075_v28  ;;  %v1105_v38 = vld [vmem:[#allocation7 + $0x60] ss:$8 sps:$4 sm:$0xff]   ;;  %v1106_v39 = vld [vmem:[#allocation7 + $0x74] ss:$8 sps:$4 sm:$0xff]   ;;  %v1111_v40 = vld [vmem:[#allocation7 + $0x70] ss:$8 sps:$4 sm:$0xff]  }
  0x52   :  { %670 = vmatprep.subr.bf16.mxu1 %v1076_v29  ;;  %v1112_v41 = vld [vmem:[#allocation7 + $0x84] ss:$8 sps:$4 sm:$0xff]   ;;  %v1117_v42 = vld [vmem:[#allocation7 + $0x80] ss:$8 sps:$4 sm:$0xff]   ;;  %v1118_v43 = vld [vmem:[#allocation7 + $0x94] ss:$8 sps:$4 sm:$0xff]  }
  0x53   :  { %v153_v17 = vrot.slane %v105_v16, %v152_v15  ;;  %v160_v22 = vrot.slane %v146_v20, %v152_v15  ;;  %v1123_v44 = vld [vmem:[#allocation7 + $0x90] ss:$8 sps:$4 sm:$0xff]   ;;  %v1124_v45 = vld [vmem:[#allocation7 + $0xa4] ss:$8 sps:$4 sm:$0xff]   ;;  %v1129_v46 = vld [vmem:[#allocation7 + $0xa0] ss:$8 sps:$4 sm:$0xff]  }
  0x54   :  { %98 = vadd.xlane.f32.xlu0 %v97_v9  ;;  %v1130_v47 = vld [vmem:[#allocation7 + $0xb4] ss:$8 sps:$4 sm:$0xff]   ;;  %v1135_v48 = vld [vmem:[#allocation7 + $0xb0] ss:$8 sps:$4 sm:$0xff]   ;;  %v1136_v49 = vld [vmem:[#allocation7 + $0xc4] ss:$8 sps:$4 sm:$0xff]  }
  0x55   :  { %v161_v18 = vcombine.high %v153_v17, %v153_v17  ;;  %v169_v19 = vsel %vm167_vm1, %v153_v17, 0  ;;  %v162_v23 = vcombine.high %v160_v22, %v160_v22  ;;  %v1418_v24 = vsel %vm167_vm1, %v160_v22, 0  ;;  %671 = vmatpush1.bf16.msra.mxu1 %v1081_v30  ;;  %v1141_v50 = vld [vmem:[#allocation7 + $0xc0] ss:$8 sps:$4 sm:$0xff]   ;;  %v1142_v51 = vld [vmem:[#allocation7 + $0xd4] ss:$8 sps:$4 sm:$0xff]  }
  0x56   :  { %672 = vmatprep.subr.bf16.mxu1 %v1082_v31  ;;  %v1147_v52 = vld [vmem:[#allocation7 + $0xd0] ss:$8 sps:$4 sm:$0xff]   ;;  %v133_v55 = vand.u32 127, %v108_v10  ;;  %vm142_vm2 = vcmask 1041409   ;;  %vm163_vm3 = vcmask 31744   ;;  %s934_s8 = sshll.u32 %s1310_s30, 4  ;;  %s935_s8 = int_to_ptr.vmem [resolvable:$true] %s934_s8 }
  0x57   :  { %945 = vmatprep.subr.msk.bf16.mxu0 %vm167_vm1, %v161_v18  ;;  %v1080_v3 = vld [vmem:[#allocation7 + $0x104] ss:$8 sps:$4 sm:$0xff]   ;;  %v1078_v4 = vld [vmem:[#allocation7 + $0x100] ss:$8 sps:$4 sm:$0xff]   ;;  %v1086_v5 = vld [vmem:[#allocation7 + $0x114] ss:$8 sps:$4 sm:$0xff]   ;;  %p1275_p5 = scmp.lt.s32.totalorder %s935_s8, %s935_s8 }
  0x58   :  { %181 = vmatpush1.bf16.msra.mxu0 %v169_v19  ;;  %v136_v59 = vsub.s32 %v133_v55, %v1414_v11  ;;  %v1084_v6 = vld [vmem:[#allocation7 + $0x110] ss:$8 sps:$4 sm:$0xff]   ;;  %v1092_v7 = vld [vmem:[#allocation7 + $0x124] ss:$8 sps:$4 sm:$0xff]   ;;  %v1090_v8 = vld [vmem:[#allocation7 + $0x120] ss:$8 sps:$4 sm:$0xff]  }
  0x59   :  { %947 = vmatprep.subr.msk.bf16.mxu0 %vm167_vm1, %v162_v23  ;;  %673 = vmatpush1.bf16.msra.mxu1 %v1087_v32  ;;  %v1098_v9 = vld [vmem:[#allocation7 + $0x134] ss:$8 sps:$4 sm:$0xff]   ;;  %v1096_v10 = vld [vmem:[#allocation7 + $0x130] ss:$8 sps:$4 sm:$0xff]   ;;  %v1104_v12 = vld [vmem:[#allocation7 + $0x144] ss:$8 sps:$4 sm:$0xff]  }
  0x5a   :  { %674 = vmatprep.subr.bf16.mxu1 %v1088_v33  ;;  %v1102_v13 = vld [vmem:[#allocation7 + $0x140] ss:$8 sps:$4 sm:$0xff]   ;;  %v1110_v14 = vld [vmem:[#allocation7 + $0x154] ss:$8 sps:$4 sm:$0xff]   ;;  %v1108_v15 = vld [vmem:[#allocation7 + $0x150] ss:$8 sps:$4 sm:$0xff]  }
  0x5b   :  { %v1116_v16 = vld [vmem:[#allocation7 + $0x164] ss:$8 sps:$4 sm:$0xff]   ;;  %v1114_v17 = vld [vmem:[#allocation7 + $0x160] ss:$8 sps:$4 sm:$0xff]   ;;  %v1122_v18 = vld [vmem:[#allocation7 + $0x174] ss:$8 sps:$4 sm:$0xff]  }
  0x5c   :  { %v1120_v19 = vld [vmem:[#allocation7 + $0x170] ss:$8 sps:$4 sm:$0xff]   ;;  %v1128_v20 = vld [vmem:[#allocation7 + $0x184] ss:$8 sps:$4 sm:$0xff]   ;;  %v1134_v22 = vld [vmem:[#allocation7 + $0x194] ss:$8 sps:$4 sm:$0xff]  }
  0x5d   :  { %675 = vmatpush1.bf16.msra.mxu1 %v1093_v34  ;;  %v1132_v23 = vld [vmem:[#allocation7 + $0x190] ss:$8 sps:$4 sm:$0xff]   ;;  %v1138_v25 = vld [vmem:[#allocation7 + $0x1a0] ss:$8 sps:$4 sm:$0xff]   ;;  %v1146_v26 = vld [vmem:[#allocation7 + $0x1b4] ss:$8 sps:$4 sm:$0xff]  }
  0x5e   :  { %676 = vmatprep.subr.bf16.mxu1 %v1094_v35  ;;  %v1144_v27 = vld [vmem:[#allocation7 + $0x1b0] ss:$8 sps:$4 sm:$0xff]   ;;  %v1148_v28 = vld [vmem:[#allocation7 + $0xe4] ss:$8 sps:$4 sm:$0xff]   ;;  %v1150_v30 = vld [vmem:[#allocation7 + $0x1c0] ss:$8 sps:$4 sm:$0xff]  }
  0x5f   :  { %v1152_v29 = vld [vmem:[#allocation7 + $0x1c4] ss:$8 sps:$4 sm:$0xff]   ;;  %v1153_v31 = vld [vmem:[#allocation7 + $0xe0] ss:$8 sps:$4 sm:$0xff]   ;;  %v1154_v32 = vld [vmem:[#allocation7 + $0xf4] ss:$8 sps:$4 sm:$0xff]  }
  0x60   :  { %v1158_v33 = vld [vmem:[#allocation7 + $0x1d4] ss:$8 sps:$4 sm:$0xff]   ;;  %v1156_v34 = vld [vmem:[#allocation7 + $0x1d0] ss:$8 sps:$4 sm:$0xff]   ;;  %s1270_s9 = scalar_lea.vmem %s935_s8, 32 }
  0x61   :  { %677 = vmatpush1.bf16.msra.mxu1 %v1099_v36  ;;  %v1159_v35 = vld [vmem:[#allocation7 + $0xf0] ss:$8 sps:$4 sm:$0xff]   ;;  %v1162_v36 = vld [vmem:[#allocation7 + $0x1e4] ss:$8 sps:$4 sm:$0xff]   ;;  %p1271_p4 = scmp.ne.s32.totalorder %s935_s8, %s1270_s9  ;;  %p1276_p6 = scmp.lt.s32.totalorder %s1270_s9, %s1270_s9 }
  0x62   :  { %678 = vmatprep.subr.bf16.mxu1 %v1100_v37  ;;  %v1160_v37 = vld [vmem:[#allocation7 + $0x1e0] ss:$8 sps:$4 sm:$0xff]  }
  0x63   :  { %p1277_p7 = por %p1276_p6, %p1275_p5 }
  0x65   :  { %679 = vmatpush1.bf16.msra.mxu1 %v1105_v38  ;;  %v1165_v38 = vld [vmem:[#allocation7 + $0x1f4] ss:$8 sps:$4 sm:$0xff]   ;;  %p1278_p8 = pnand %p1277_p7, %p1271_p4 }
  0x66   :  { %680 = vmatprep.subr.bf16.mxu1 %v1106_v39  ;;  %v1163_v39 = vld [vmem:[#allocation7 + $0x1f0] ss:$8 sps:$4 sm:$0xff]  }
  0x69   :  { %681 = vmatpush1.bf16.msra.mxu1 %v1111_v40  ;;  %v1166_v40 = vld [vmem:[#allocation8 + $0x40] sm:$0xff]  }
  0x6a   :  { %682 = vmatprep.subr.bf16.mxu1 %v1112_v41  ;;  %v110_v41 = vsub.s32 0, %v1414_v11 }
  0x6d   :  { %683 = vmatpush1.bf16.msra.mxu1 %v1117_v42  ;;  %v106_v42 = vld [vmem:[%s1459_s2] sm:$0xf] }
  0x6e   :  { %684 = vmatprep.subr.bf16.mxu1 %v1118_v43  ;;  %v114_v43 = vsub.s32 1, %v1414_v11 }
  0x71   :  { %685 = vmatpush1.bf16.msra.mxu1 %v1123_v44  ;;  %v111_v44 = vrot.slane %v106_v42, %v110_v41 }
  0x72   :  { %686 = vmatprep.subr.bf16.mxu1 %v1124_v45  ;;  %v115_v45 = vrot.slane %v106_v42, %v114_v43 }
  0x75   :  { %687 = vmatpush1.bf16.msra.mxu1 %v1129_v46 }
  0x76   :  { %688 = vmatprep.subr.bf16.mxu1 %v1130_v47 }
  0x79   :  { %689 = vmatpush1.bf16.msra.mxu1 %v1135_v48 }
  0x7a   :  { %690 = vmatprep.subr.bf16.mxu1 %v1136_v49  ;;  %v118_v49 = vsub.s32 2, %v1414_v11 }
  0x7d   :  { %691 = vmatpush1.bf16.msra.mxu1 %v1141_v50 }
  0x7e   :  { %692 = vmatprep.subr.bf16.mxu1 %v1142_v51 }
  0x81   :  { %693 = vmatpush1.bf16.msra.mxu1 %v1147_v52  ;;  %v122_v52 = vsub.s32 3, %v1414_v11  ;;  %v1013_v11 = vld [vmem:[%s1463_s6] ss:$0 sm:$0xff] }
  0x82   :  { %694 = vmatprep.subr.bf16.mxu1 %v1148_v28 }
  0x85   :  { %695 = vmatpush1.bf16.msra.mxu1 %v1153_v31 }
  0x86   :  { %696 = vmatprep.subr.bf16.mxu1 %v1154_v32 }
  0x89   :  { %697 = vmatpush1.bf16.msra.mxu1 %v1159_v35 }
  0x8a   :  { %1030 = vmatprep.subr.bf16.mxu1 %v1166_v40 }
  0xdd   :  { %v94_v53 = vpop.xlane.xlu0 %93 }
  0xde   :  { %v101_v54 = vmul.f32 0.00390625, %v94_v53 }
  0xe0   :  { %v103_v56 = vpack.c.bf16 %v101_v54, %v101_v54 }
  0xe1   :  { %v99_v57 = vpop.xlane.xlu0 %98 }
  0xe2   :  { %v102_v58 = vmul.f32 0.00390625, %v99_v57  ;;  %v130_v60 = vunpack.c.l.b16 %v103_v56  ;;  %v119_v56 = vrot.slane %v106_v42, %v118_v49 }
  0xe4   :  { %v104_v61 = vpack.c.bf16 %v102_v58, %v102_v58  ;;  %v137_v63 = vrot.slane %v130_v60, %v136_v59  ;;  %v123_v58 = vrot.slane %v106_v42, %v122_v52 }
  0xe6   :  { %v131_v62 = vunpack.c.l.b16 %v104_v61  ;;  %v1168_v61 = vld [vmem:[#allocation8 + $0x48] sm:$0xff]  }
  0xe8   :  { %v141_v0 = vrot.slane %v131_v62, %v136_v59  ;;  %v1167_v59 = vld [vmem:[#allocation8] sm:$0xff]  }
  0xea   :  { %v143_v1 = vsel %vm142_vm2, %v141_v0, %v137_v63 }
  0xeb   :  { %v144_v2 = vpack.c.b16 %v143_v1, %v143_v1 }
  0xed   :  { %946 = vmatmul.mubr.msk.bf16.vlgmr.msra.gmra.mrb[0].mxu0 %vm163_vm3, %v144_v2 }
  0xee   :  { %222 = vmatpush1.bf16.msra.mxu0 %v1418_v24  ;;  %253 = vmatprep.mubr.bf16.mxu0 %v1309_v21  ;;  %v1126_v21 = vld [vmem:[#allocation7 + $0x180] ss:$8 sps:$4 sm:$0xff]   ;;  %v1140_v24 = vld [vmem:[#allocation7 + $0x1a4] ss:$8 sps:$4 sm:$0xff]  }
  0xef   :  { %707 = vmatprep.subr.bf16.mxu0 %v1080_v3  ;;  %v1169_v3 = vld [vmem:[#allocation8 + $0x8] sm:$0xff]  }
  0xf5   :  { %948 = vmatmul.mubr.msk.bf16.vlgmr.msra.gmra.mrb[4].mxu0 %vm163_vm3, %v144_v2 }
  0xf6   :  { %708 = vmatpush1.bf16.msra.mxu0 %v1078_v4 }
  0xf7   :  { %709 = vmatprep.subr.bf16.mxu0 %v1086_v5 }
  0xfa   :  { %710 = vmatpush1.bf16.msra.mxu0 %v1084_v6  ;;  %v1170_v6 = vld [vmem:[#allocation8 + $0x50] sm:$0xff]  }
  0xfb   :  { %711 = vmatprep.subr.bf16.mxu0 %v1092_v7 }
  0xfe   :  { %712 = vmatpush1.bf16.msra.mxu0 %v1090_v8 }
  0xff   :  { %713 = vmatprep.subr.bf16.mxu0 %v1098_v9  ;;  %v1171_v9 = vld [vmem:[#allocation8 + $0x10] sm:$0xff]  }
 0x102   :  { %714 = vmatpush1.bf16.msra.mxu0 %v1096_v10 }
 0x103   :  { %715 = vmatprep.subr.bf16.mxu0 %v1104_v12  ;;  %v1172_v12 = vld [vmem:[#allocation8 + $0x58] sm:$0xff]  }
 0x106   :  { %716 = vmatpush1.bf16.msra.mxu0 %v1102_v13  ;;  %v1173_v13 = vld [vmem:[#allocation8 + $0x18] sm:$0xff]  }
 0x107   :  { %717 = vmatprep.subr.bf16.mxu0 %v1110_v14  ;;  %v1174_v14 = vld [vmem:[#allocation8 + $0x60] sm:$0xff]  }
 0x10a   :  { %718 = vmatpush1.bf16.msra.mxu0 %v1108_v15  ;;  %v1175_v15 = vld [vmem:[#allocation8 + $0x20] sm:$0xff]  }
 0x10b   :  { %719 = vmatprep.subr.bf16.mxu0 %v1116_v16  ;;  %v1176_v16 = vld [vmem:[#allocation8 + $0x68] sm:$0xff]  }
 0x10e   :  { %720 = vmatpush1.bf16.msra.mxu0 %v1114_v17  ;;  %v1177_v17 = vld [vmem:[#allocation8 + $0x28] sm:$0xff]  }
 0x10f   :  { %721 = vmatprep.subr.bf16.mxu0 %v1122_v18  ;;  %v1178_v18 = vld [vmem:[#allocation8 + $0x70] sm:$0xff]  }
 0x112   :  { %722 = vmatpush1.bf16.msra.mxu0 %v1120_v19  ;;  %v1179_v19 = vld [vmem:[#allocation8 + $0x30] sm:$0xff]  }
 0x113   :  { %723 = vmatprep.subr.bf16.mxu0 %v1128_v20  ;;  %v1180_v20 = vld [vmem:[#allocation8 + $0x78] sm:$0xff]  }
 0x116   :  { %724 = vmatpush1.bf16.msra.mxu0 %v1126_v21  ;;  %v1181_v21 = vld [vmem:[#allocation8 + $0x38] sm:$0xff]  }
 0x117   :  { %725 = vmatprep.subr.bf16.mxu0 %v1134_v22  ;;  %v334_v22 = vld [vmem:[%s1461_s4] sm:$0x3] }
 0x118   :  { %v343_v28 = vrot.slane %v334_v22, %v114_v43 }
 0x11a   :  { %726 = vmatpush1.bf16.msra.mxu0 %v1132_v23 }
 0x11b   :  { %727 = vmatprep.subr.bf16.mxu0 %v1140_v24 }
 0x11e   :  { %728 = vmatpush1.bf16.msra.mxu0 %v1138_v25 }
 0x11f   :  { %729 = vmatprep.subr.bf16.mxu0 %v1146_v26  ;;  %v339_v26 = vrot.slane %v334_v22, %v110_v41 }
 0x122   :  { %730 = vmatpush1.bf16.msra.mxu0 %v1144_v27 }
 0x123   :  { %731 = vmatprep.subr.bf16.mxu0 %v1152_v29 }
 0x126   :  { %732 = vmatpush1.bf16.msra.mxu0 %v1150_v30 }
 0x127   :  { %733 = vmatprep.subr.bf16.mxu0 %v1158_v33 }
 0x12a   :  { %734 = vmatpush1.bf16.msra.mxu0 %v1156_v34 }
 0x12b   :  { %735 = vmatprep.subr.bf16.mxu0 %v1162_v36 }
 0x12e   :  { %736 = vmatpush1.bf16.msra.mxu0 %v1160_v37 }
 0x12f   :  { %737 = vmatprep.subr.bf16.mxu0 %v1165_v38 }
 0x132   :  { %738 = vmatpush1.bf16.msra.mxu0 %v1163_v39 }
 0x1c0   :  { %v214_v46 = vpop.f32.mrb[0].mxu0 }
 0x1c1   :  { %v215_v47 = vadd.f32 %v214_v46, %v111_v44  ;;  %v216_v48 = vpop.f32.mrb[1].mxu0 }
 0x1c2   :  { %v217_v50 = vadd.f32 %v216_v48, %v115_v45  ;;  %v218_v51 = vpop.f32.mrb[2].mxu0 }
 0x1c3   :  { %v262_v53 = vmax.f32 %v215_v47, 0.0  ;;  %v219_v54 = vpop.f32.mrb[3].mxu0 }
 0x1c4   :  { %v263_v55 = vmax.f32 %v217_v50, 0.0 }
 0x1c5   :  { %v266_v60 = vpack.c.bf16 %v262_v53, %v262_v53 }
 0x1c6   :  { %v267_v57 = vpack.c.bf16 %v263_v55, %v263_v55 }
 0x1c8   :  { %v255_v62 = vpop.f32.mrb[4].mxu0  ;;  %698 = vmatprep.mubr.bf16.mxu1 %v267_v57 }
 0x1c9   :  { %v256_v63 = vadd.f32 %v255_v62, %v119_v56  ;;  %v257_v0 = vpop.f32.mrb[5].mxu0  ;;  %699 = vmatmul.mubr.bf16.vlgmr.msra.gmra.mrb[0].mxu1 %v266_v60 }
 0x1ca   :  { %v258_v1 = vadd.f32 %v257_v0, %v123_v58  ;;  %v259_v2 = vpop.f32.mrb[6].mxu0  ;;  %1031 = vmatpush3.bf16.msra.mxu1 %v1167_v59 }
 0x1cb   :  { %v264_v4 = vmax.f32 %v256_v63, 0.0  ;;  %v260_v5 = vpop.f32.mrb[7].mxu0  ;;  %1032 = vmatprep.subr.bf16.mxu1 %v1168_v61 }
 0x1cc   :  { %v265_v7 = vmax.f32 %v258_v1, 0.0 }
 0x1cd   :  { %v268_v10 = vpack.c.bf16 %v264_v4, %v264_v4 }
 0x1ce   :  { %v269_v8 = vpack.c.bf16 %v265_v7, %v265_v7  ;;  %1033 = vmatpush3.bf16.msra.mxu1 %v1169_v3 }
 0x1cf   :  { %1034 = vmatprep.subr.bf16.mxu1 %v1170_v6 }
 0x1d0   :  { %739 = vmatprep.mubr.bf16.mxu0 %v269_v8 }
 0x1d1   :  { %740 = vmatmul.mubr.bf16.vlgmr.msra.gmra.mrb[8].mxu0 %v268_v10 }
 0x1d2   :  { %1035 = vmatpush3.bf16.msra.mxu1 %v1171_v9 }
 0x1d3   :  { %1036 = vmatprep.subr.bf16.mxu1 %v1172_v12 }
 0x1d6   :  { %1037 = vmatpush3.bf16.msra.mxu1 %v1173_v13 }
 0x1d7   :  { %1038 = vmatprep.subr.bf16.mxu1 %v1174_v14 }
 0x1da   :  { %1039 = vmatpush3.bf16.msra.mxu1 %v1175_v15 }
 0x1db   :  { %1040 = vmatprep.subr.bf16.mxu1 %v1176_v16 }
 0x1de   :  { %1041 = vmatpush3.bf16.msra.mxu1 %v1177_v17 }
 0x1df   :  { %1042 = vmatprep.subr.bf16.mxu1 %v1178_v18 }
 0x1e2   :  { %1043 = vmatpush3.bf16.msra.mxu1 %v1179_v19 }
 0x1e3   :  { %1044 = vmatprep.subr.bf16.mxu1 %v1180_v20 }
 0x1e6   :  { %1045 = vmatpush3.bf16.msra.mxu1 %v1181_v21 }
 0x29c   :  { %v700_v23 = vpop.f32.mrb[0].mxu1 }
 0x29d   :  { %v702_v24 = vpop.f32.mrb[1].mxu1  ;;  %v701_v29 = vadd.f32 %v700_v23, %v339_v26 }
 0x29e   :  { %v704_v25 = vpop.f32.mrb[2].mxu1  ;;  %v703_v30 = vadd.f32 %v702_v24, %v343_v28 }
 0x29f   :  { %v705_v27 = vpop.f32.mrb[3].mxu1 }
 0x2a4   :  { %v741_v31 = vpop.f32.mrb[8].mxu0 }
 0x2a5   :  { %v742_v32 = vadd.f32 %v741_v31, %v701_v29  ;;  %v743_v33 = vpop.f32.mrb[9].mxu0 }
 0x2a6   :  { %v744_v34 = vadd.f32 %v743_v33, %v703_v30  ;;  %v745_v35 = vpop.f32.mrb[10].mxu0 }
 0x2a7   :  { %v748_v36 = vmax.f32 %v742_v32, 0.0  ;;  %v746_v37 = vpop.f32.mrb[11].mxu0 }
 0x2a8   :  { %v749_v38 = vmax.f32 %v744_v34, 0.0 }
 0x2a9   :  { %v750_v40 = vpack.c.bf16 %v748_v36, %v748_v36 }
 0x2aa   :  { %v751_v39 = vpack.c.bf16 %v749_v38, %v749_v38 }
 0x2ac   :  { %919 = vmatprep.mubr.bf16.mxu1 %v751_v39 }
 0x2ad   :  { %920 = vmatmul.mubr.bf16.vlgmr.msra.gmra.mrb[4].mxu1 %v750_v40 }
 0x380   :  { %v1046_v42 = vpop.f32.mrb[4].mxu1 }
 0x381   :  { %v1047_v41 = vpop.f32.mrb[5].mxu1 }
 0x382   :  { %v1048_v43 = vadd.f32 %v1047_v41, %v1046_v42  ;;  %v1049_v44 = vpop.f32.mrb[6].mxu1 }
 0x383   :  { %v1050_v45 = vpop.f32.mrb[7].mxu1 }
 0x384   :  { %v922_v46 = vadd.f32 %v1048_v43, %v1013_v11 }
 0x386   :  { %927 = vst [vmem:[#allocation10] sm:$0x3] %v922_v46 }
 0x387   :  { %1281 = shalt.err (!%p1278_p8)
}
 0x388   :  { %s1282_s6 = scalar_lea.hbm %s1464_s7, 32 }
 0x389   :  { %p1283_p9 = scmp.ne.s32.totalorder %s1464_s7, %s1282_s6  ;;  %p1286_p10 = scmp.lt.u32.totalorder %s1282_s6, %s1464_s7 }
 0x38b   :  { %p1288_p11 = pnand %p1286_p10, %p1283_p9 }
 0x38d   :  { %1291 = shalt.err (!%p1288_p11)
}
 0x38e   :  { %937 = dma.vmem_to_hbm [thread:$0]  %s935_s8, 32, %s1464_s7, [#allocation4]  }
 0x38f   :  { %1298 = dma.done.wait [#allocation4], 32  }
 0x390   :  { %1299 = vsyncadd [#allocation4], 4294967264 }
 0x391   :  { %941 = vsyncpa [#allocation3], 1 }
 0x392   :  { %942 = vsyncpa [#allocation6], 1 }
 0x393   :  { %943 = vsyncpa [#allocation9], 1 }
 0x394   :  { %944 = vsyncpa [#allocation4], 1 }

</bundles_post_ra>
